<compile_context>
chip_gen: v7x
topology: tpu7x:2x2x1
jax: 0.10.0
libtpu: 0.0.40
codegen_flags: <defaults>
</compile_context>

<pallas_src>
import jax
import jax.numpy as jnp
from jax.experimental import pallas as pl
from jax.experimental.pallas import tpu as pltpu

IN_FEATURES = 2
OUT_FEATURES = 3
BATCH_SHAPE = (4, 3)                      # leading dims of the module input
ROWS = BATCH_SHAPE[0] * BATCH_SHAPE[1]    # 12


def make_linear_k2_kernel(w_rows, b_vals):
    """Build the kernel with Linear(2,3) parameters baked in as constants.

    w_rows: ((w00,w01,w02), (w10,w11,w12))  python floats, layout (in, out)
    b_vals: (b0, b1, b2)                    python floats
    """
    w0 = tuple(float(v) for v in w_rows[0])
    w1 = tuple(float(v) for v in w_rows[1])
    bb = tuple(float(v) for v in b_vals)

    def kernel(x_ref, o_ref):
        # x_ref: (4, 3, 2) f32, o_ref: (12, 3) f32.
        # The (4,3,2)->(12,2) flatten is fused here: statically unroll the
        # leading dim and write each (3, 1) output column directly.  Every
        # multiply-add is a scalar-splat FMA on the VALU; weights/bias are
        # immediates, so the only runtime traffic is one input DMA in and one
        # output DMA out.
        for i in range(BATCH_SHAPE[0]):
            xi = x_ref[i]                 # (3, 2) — static first-axis index
            x0 = xi[:, 0:1]               # (3, 1)
            x1 = xi[:, 1:2]               # (3, 1)
            r = i * BATCH_SHAPE[1]
            for j in range(OUT_FEATURES):
                col = x0 * w0[j] + x1 * w1[j] + bb[j]          # (3, 1) f32
                o_ref[r:r + BATCH_SHAPE[1], j:j + 1] = col

    return kernel


def make_model_forward(w, b):
    """One-time parameter bake (outside the hot path).

    w: (3, 2) float32 -- nn.Linear(2, 3).weight in torch layout (out, in)
    b: (3,)  float32 -- nn.Linear(2, 3).bias
    Returns forward(x): (4, 3, 2) f32 -> (12, 3) f32.
    """
    # Transpose to (in, out) while pulling values host-side as Python floats.
    w_rows = tuple(tuple(float(w[o, i]) for o in range(OUT_FEATURES))
                   for i in range(IN_FEATURES))
    b_vals = tuple(float(b[o]) for o in range(OUT_FEATURES))

    kernel = make_linear_k2_kernel(w_rows, b_vals)

    vmem = pl.BlockSpec(memory_space=pltpu.MemorySpace.VMEM)
    call = pl.pallas_call(
        kernel,
        out_shape=jax.ShapeDtypeStruct((ROWS, OUT_FEATURES), jnp.float32),
        in_specs=[vmem],
        out_specs=vmem,
    )

    def forward(x):
        # No wrapper-side reshape/transpose: the flatten lives in the kernel,
        # so the traced graph is just the single custom call on (4, 3, 2).
        return call(x)

    return forward


if __name__ == "__main__":
    key = jax.random.PRNGKey(0)
    kx, kw, kb = jax.random.split(key, 3)

    # Input consistent with the module: torch.randn(4, 3, 2)
    x = jax.random.normal(kx, (4, 3, 2), dtype=jnp.float32)

    # nn.Linear(2, 3) parameter init: U(-1/sqrt(in), 1/sqrt(in)), torch layout.
    bound = 1.0 / (IN_FEATURES ** 0.5)
    w = jax.random.uniform(kw, (OUT_FEATURES, IN_FEATURES),
                           minval=-bound, maxval=bound, dtype=jnp.float32)
    b = jax.random.uniform(kb, (OUT_FEATURES,),
                           minval=-bound, maxval=bound, dtype=jnp.float32)

    forward = jax.jit(make_model_forward(w, b))
    out = jax.block_until_ready(forward(x))

    # Reference check in plain JAX (torch semantics: x @ W^T + b)
    ref = x.reshape(ROWS, IN_FEATURES) @ w.T + b
    assert out.shape == (ROWS, OUT_FEATURES)
    assert jnp.allclose(out, ref, atol=1e-5, rtol=1e-5)

    print("KERNEL_OK")
</pallas_src>

<mosaic_0001>
module attributes {stable_mosaic.version = 11 : i64} {
  func.func @kernel(%arg0: memref<4x3x2xf32, #tpu.memory_space<vmem>>, %arg1: memref<12x3xf32, #tpu.memory_space<vmem>>) attributes {dimension_semantics = [], scalar_prefetch = 0 : i64, scratch_operands = 0 : i64, tpu.core_type = #tpu.core_type<tc>} {
    %c0 = arith.constant 0 : index
    %c0_0 = arith.constant 0 : index
    %c0_1 = arith.constant 0 : index
    %0 = vector.load %arg0[%c0, %c0_0, %c0_1] : memref<4x3x2xf32, #tpu.memory_space<vmem>>, vector<1x3x2xf32>
    %1 = vector.shape_cast %0 : vector<1x3x2xf32> to vector<3x2xf32>
    %2 = vector.extract_strided_slice %1 {offsets = [0, 0], sizes = [3, 1], strides = [1, 1]} : vector<3x2xf32> to vector<3x1xf32>
    %3 = vector.extract_strided_slice %1 {offsets = [0, 1], sizes = [3, 1], strides = [1, 1]} : vector<3x2xf32> to vector<3x1xf32>
    %cst = arith.constant -0.696791768 : f32
    %4 = vector.broadcast %cst : f32 to vector<3x1xf32>
    %5 = arith.mulf %2, %4 : vector<3x1xf32>
    %cst_2 = arith.constant -0.677562177 : f32
    %6 = vector.broadcast %cst_2 : f32 to vector<3x1xf32>
    %7 = arith.mulf %3, %6 : vector<3x1xf32>
    %8 = arith.addf %5, %7 : vector<3x1xf32>
    %cst_3 = arith.constant 0.569149494 : f32
    %9 = vector.broadcast %cst_3 : f32 to vector<3x1xf32>
    %10 = arith.addf %8, %9 : vector<3x1xf32>
    %c0_4 = arith.constant 0 : index
    %c0_5 = arith.constant 0 : index
    %11 = vector.load %arg1[%c0_4, %c0_5] : memref<12x3xf32, #tpu.memory_space<vmem>>, vector<3x1xf32>
    tpu.vector_store %arg1[%c0_4, %c0_5], %10 {strides = array<i32>} : memref<12x3xf32, #tpu.memory_space<vmem>>, vector<3x1xf32>,
    %cst_6 = arith.constant 0.11515446 : f32
    %12 = vector.broadcast %cst_6 : f32 to vector<3x1xf32>
    %13 = arith.mulf %2, %12 : vector<3x1xf32>
    %cst_7 = arith.constant -0.195390597 : f32
    %14 = vector.broadcast %cst_7 : f32 to vector<3x1xf32>
    %15 = arith.mulf %3, %14 : vector<3x1xf32>
    %16 = arith.addf %13, %15 : vector<3x1xf32>
    %cst_8 = arith.constant 0.583070099 : f32
    %17 = vector.broadcast %cst_8 : f32 to vector<3x1xf32>
    %18 = arith.addf %16, %17 : vector<3x1xf32>
    %c0_9 = arith.constant 0 : index
    %c1 = arith.constant 1 : index
    %19 = vector.load %arg1[%c0_9, %c1] : memref<12x3xf32, #tpu.memory_space<vmem>>, vector<3x1xf32>
    tpu.vector_store %arg1[%c0_9, %c1], %18 {strides = array<i32>} : memref<12x3xf32, #tpu.memory_space<vmem>>, vector<3x1xf32>,
    %cst_10 = arith.constant -0.391683817 : f32
    %20 = vector.broadcast %cst_10 : f32 to vector<3x1xf32>
    %21 = arith.mulf %2, %20 : vector<3x1xf32>
    %cst_11 = arith.constant -0.538407624 : f32
    %22 = vector.broadcast %cst_11 : f32 to vector<3x1xf32>
    %23 = arith.mulf %3, %22 : vector<3x1xf32>
    %24 = arith.addf %21, %23 : vector<3x1xf32>
    %cst_12 = arith.constant -0.22479257 : f32
    %25 = vector.broadcast %cst_12 : f32 to vector<3x1xf32>
    %26 = arith.addf %24, %25 : vector<3x1xf32>
    %c0_13 = arith.constant 0 : index
    %c2 = arith.constant 2 : index
    %27 = vector.load %arg1[%c0_13, %c2] : memref<12x3xf32, #tpu.memory_space<vmem>>, vector<3x1xf32>
    tpu.vector_store %arg1[%c0_13, %c2], %26 {strides = array<i32>} : memref<12x3xf32, #tpu.memory_space<vmem>>, vector<3x1xf32>,
    %c1_14 = arith.constant 1 : index
    %c0_15 = arith.constant 0 : index
    %c0_16 = arith.constant 0 : index
    %28 = vector.load %arg0[%c1_14, %c0_15, %c0_16] : memref<4x3x2xf32, #tpu.memory_space<vmem>>, vector<1x3x2xf32>
    %29 = vector.shape_cast %28 : vector<1x3x2xf32> to vector<3x2xf32>
    %30 = vector.extract_strided_slice %29 {offsets = [0, 0], sizes = [3, 1], strides = [1, 1]} : vector<3x2xf32> to vector<3x1xf32>
    %31 = vector.extract_strided_slice %29 {offsets = [0, 1], sizes = [3, 1], strides = [1, 1]} : vector<3x2xf32> to vector<3x1xf32>
    %cst_17 = arith.constant -0.696791768 : f32
    %32 = vector.broadcast %cst_17 : f32 to vector<3x1xf32>
    %33 = arith.mulf %30, %32 : vector<3x1xf32>
    %cst_18 = arith.constant -0.677562177 : f32
    %34 = vector.broadcast %cst_18 : f32 to vector<3x1xf32>
    %35 = arith.mulf %31, %34 : vector<3x1xf32>
    %36 = arith.addf %33, %35 : vector<3x1xf32>
    %cst_19 = arith.constant 0.569149494 : f32
    %37 = vector.broadcast %cst_19 : f32 to vector<3x1xf32>
    %38 = arith.addf %36, %37 : vector<3x1xf32>
    %c3 = arith.constant 3 : index
    %c0_20 = arith.constant 0 : index
    %39 = vector.load %arg1[%c3, %c0_20] : memref<12x3xf32, #tpu.memory_space<vmem>>, vector<3x1xf32>
    tpu.vector_store %arg1[%c3, %c0_20], %38 {strides = array<i32>} : memref<12x3xf32, #tpu.memory_space<vmem>>, vector<3x1xf32>,
    %cst_21 = arith.constant 0.11515446 : f32
    %40 = vector.broadcast %cst_21 : f32 to vector<3x1xf32>
    %41 = arith.mulf %30, %40 : vector<3x1xf32>
    %cst_22 = arith.constant -0.195390597 : f32
    %42 = vector.broadcast %cst_22 : f32 to vector<3x1xf32>
    %43 = arith.mulf %31, %42 : vector<3x1xf32>
    %44 = arith.addf %41, %43 : vector<3x1xf32>
    %cst_23 = arith.constant 0.583070099 : f32
    %45 = vector.broadcast %cst_23 : f32 to vector<3x1xf32>
    %46 = arith.addf %44, %45 : vector<3x1xf32>
    %c3_24 = arith.constant 3 : index
    %c1_25 = arith.constant 1 : index
    %47 = vector.load %arg1[%c3_24, %c1_25] : memref<12x3xf32, #tpu.memory_space<vmem>>, vector<3x1xf32>
    tpu.vector_store %arg1[%c3_24, %c1_25], %46 {strides = array<i32>} : memref<12x3xf32, #tpu.memory_space<vmem>>, vector<3x1xf32>,
    %cst_26 = arith.constant -0.391683817 : f32
    %48 = vector.broadcast %cst_26 : f32 to vector<3x1xf32>
    %49 = arith.mulf %30, %48 : vector<3x1xf32>
    %cst_27 = arith.constant -0.538407624 : f32
    %50 = vector.broadcast %cst_27 : f32 to vector<3x1xf32>
    %51 = arith.mulf %31, %50 : vector<3x1xf32>
    %52 = arith.addf %49, %51 : vector<3x1xf32>
    %cst_28 = arith.constant -0.22479257 : f32
    %53 = vector.broadcast %cst_28 : f32 to vector<3x1xf32>
    %54 = arith.addf %52, %53 : vector<3x1xf32>
    %c3_29 = arith.constant 3 : index
    %c2_30 = arith.constant 2 : index
    %55 = vector.load %arg1[%c3_29, %c2_30] : memref<12x3xf32, #tpu.memory_space<vmem>>, vector<3x1xf32>
    tpu.vector_store %arg1[%c3_29, %c2_30], %54 {strides = array<i32>} : memref<12x3xf32, #tpu.memory_space<vmem>>, vector<3x1xf32>,
    %c2_31 = arith.constant 2 : index
    %c0_32 = arith.constant 0 : index
    %c0_33 = arith.constant 0 : index
    %56 = vector.load %arg0[%c2_31, %c0_32, %c0_33] : memref<4x3x2xf32, #tpu.memory_space<vmem>>, vector<1x3x2xf32>
    %57 = vector.shape_cast %56 : vector<1x3x2xf32> to vector<3x2xf32>
    %58 = vector.extract_strided_slice %57 {offsets = [0, 0], sizes = [3, 1], strides = [1, 1]} : vector<3x2xf32> to vector<3x1xf32>
    %59 = vector.extract_strided_slice %57 {offsets = [0, 1], sizes = [3, 1], strides = [1, 1]} : vector<3x2xf32> to vector<3x1xf32>
    %cst_34 = arith.constant -0.696791768 : f32
    %60 = vector.broadcast %cst_34 : f32 to vector<3x1xf32>
    %61 = arith.mulf %58, %60 : vector<3x1xf32>
    %cst_35 = arith.constant -0.677562177 : f32
    %62 = vector.broadcast %cst_35 : f32 to vector<3x1xf32>
    %63 = arith.mulf %59, %62 : vector<3x1xf32>
    %64 = arith.addf %61, %63 : vector<3x1xf32>
    %cst_36 = arith.constant 0.569149494 : f32
    %65 = vector.broadcast %cst_36 : f32 to vector<3x1xf32>
    %66 = arith.addf %64, %65 : vector<3x1xf32>
    %c6 = arith.constant 6 : index
    %c0_37 = arith.constant 0 : index
    %67 = vector.load %arg1[%c6, %c0_37] : memref<12x3xf32, #tpu.memory_space<vmem>>, vector<3x1xf32>
    tpu.vector_store %arg1[%c6, %c0_37], %66 {strides = array<i32>} : memref<12x3xf32, #tpu.memory_space<vmem>>, vector<3x1xf32>,
    %cst_38 = arith.constant 0.11515446 : f32
    %68 = vector.broadcast %cst_38 : f32 to vector<3x1xf32>
    %69 = arith.mulf %58, %68 : vector<3x1xf32>
    %cst_39 = arith.constant -0.195390597 : f32
    %70 = vector.broadcast %cst_39 : f32 to vector<3x1xf32>
    %71 = arith.mulf %59, %70 : vector<3x1xf32>
    %72 = arith.addf %69, %71 : vector<3x1xf32>
    %cst_40 = arith.constant 0.583070099 : f32
    %73 = vector.broadcast %cst_40 : f32 to vector<3x1xf32>
    %74 = arith.addf %72, %73 : vector<3x1xf32>
    %c6_41 = arith.constant 6 : index
    %c1_42 = arith.constant 1 : index
    %75 = vector.load %arg1[%c6_41, %c1_42] : memref<12x3xf32, #tpu.memory_space<vmem>>, vector<3x1xf32>
    tpu.vector_store %arg1[%c6_41, %c1_42], %74 {strides = array<i32>} : memref<12x3xf32, #tpu.memory_space<vmem>>, vector<3x1xf32>,
    %cst_43 = arith.constant -0.391683817 : f32
    %76 = vector.broadcast %cst_43 : f32 to vector<3x1xf32>
    %77 = arith.mulf %58, %76 : vector<3x1xf32>
    %cst_44 = arith.constant -0.538407624 : f32
    %78 = vector.broadcast %cst_44 : f32 to vector<3x1xf32>
    %79 = arith.mulf %59, %78 : vector<3x1xf32>
    %80 = arith.addf %77, %79 : vector<3x1xf32>
    %cst_45 = arith.constant -0.22479257 : f32
    %81 = vector.broadcast %cst_45 : f32 to vector<3x1xf32>
    %82 = arith.addf %80, %81 : vector<3x1xf32>
    %c6_46 = arith.constant 6 : index
    %c2_47 = arith.constant 2 : index
    %83 = vector.load %arg1[%c6_46, %c2_47] : memref<12x3xf32, #tpu.memory_space<vmem>>, vector<3x1xf32>
    tpu.vector_store %arg1[%c6_46, %c2_47], %82 {strides = array<i32>} : memref<12x3xf32, #tpu.memory_space<vmem>>, vector<3x1xf32>,
    %c3_48 = arith.constant 3 : index
    %c0_49 = arith.constant 0 : index
    %c0_50 = arith.constant 0 : index
    %84 = vector.load %arg0[%c3_48, %c0_49, %c0_50] : memref<4x3x2xf32, #tpu.memory_space<vmem>>, vector<1x3x2xf32>
    %85 = vector.shape_cast %84 : vector<1x3x2xf32> to vector<3x2xf32>
    %86 = vector.extract_strided_slice %85 {offsets = [0, 0], sizes = [3, 1], strides = [1, 1]} : vector<3x2xf32> to vector<3x1xf32>
    %87 = vector.extract_strided_slice %85 {offsets = [0, 1], sizes = [3, 1], strides = [1, 1]} : vector<3x2xf32> to vector<3x1xf32>
    %cst_51 = arith.constant -0.696791768 : f32
    %88 = vector.broadcast %cst_51 : f32 to vector<3x1xf32>
    %89 = arith.mulf %86, %88 : vector<3x1xf32>
    %cst_52 = arith.constant -0.677562177 : f32
    %90 = vector.broadcast %cst_52 : f32 to vector<3x1xf32>
    %91 = arith.mulf %87, %90 : vector<3x1xf32>
    %92 = arith.addf %89, %91 : vector<3x1xf32>
    %cst_53 = arith.constant 0.569149494 : f32
    %93 = vector.broadcast %cst_53 : f32 to vector<3x1xf32>
    %94 = arith.addf %92, %93 : vector<3x1xf32>
    %c9 = arith.constant 9 : index
    %c0_54 = arith.constant 0 : index
    %95 = vector.load %arg1[%c9, %c0_54] : memref<12x3xf32, #tpu.memory_space<vmem>>, vector<3x1xf32>
    tpu.vector_store %arg1[%c9, %c0_54], %94 {strides = array<i32>} : memref<12x3xf32, #tpu.memory_space<vmem>>, vector<3x1xf32>,
    %cst_55 = arith.constant 0.11515446 : f32
    %96 = vector.broadcast %cst_55 : f32 to vector<3x1xf32>
    %97 = arith.mulf %86, %96 : vector<3x1xf32>
    %cst_56 = arith.constant -0.195390597 : f32
    %98 = vector.broadcast %cst_56 : f32 to vector<3x1xf32>
    %99 = arith.mulf %87, %98 : vector<3x1xf32>
    %100 = arith.addf %97, %99 : vector<3x1xf32>
    %cst_57 = arith.constant 0.583070099 : f32
    %101 = vector.broadcast %cst_57 : f32 to vector<3x1xf32>
    %102 = arith.addf %100, %101 : vector<3x1xf32>
    %c9_58 = arith.constant 9 : index
    %c1_59 = arith.constant 1 : index
    %103 = vector.load %arg1[%c9_58, %c1_59] : memref<12x3xf32, #tpu.memory_space<vmem>>, vector<3x1xf32>
    tpu.vector_store %arg1[%c9_58, %c1_59], %102 {strides = array<i32>} : memref<12x3xf32, #tpu.memory_space<vmem>>, vector<3x1xf32>,
    %cst_60 = arith.constant -0.391683817 : f32
    %104 = vector.broadcast %cst_60 : f32 to vector<3x1xf32>
    %105 = arith.mulf %86, %104 : vector<3x1xf32>
    %cst_61 = arith.constant -0.538407624 : f32
    %106 = vector.broadcast %cst_61 : f32 to vector<3x1xf32>
    %107 = arith.mulf %87, %106 : vector<3x1xf32>
    %108 = arith.addf %105, %107 : vector<3x1xf32>
    %cst_62 = arith.constant -0.22479257 : f32
    %109 = vector.broadcast %cst_62 : f32 to vector<3x1xf32>
    %110 = arith.addf %108, %109 : vector<3x1xf32>
    %c9_63 = arith.constant 9 : index
    %c2_64 = arith.constant 2 : index
    %111 = vector.load %arg1[%c9_63, %c2_64] : memref<12x3xf32, #tpu.memory_space<vmem>>, vector<3x1xf32>
    tpu.vector_store %arg1[%c9_63, %c2_64], %110 {strides = array<i32>} : memref<12x3xf32, #tpu.memory_space<vmem>>, vector<3x1xf32>,
    return
  }
}

</mosaic_0001>

<bundles_post_ra>
// kernel: forward.1
= control target key start
LH: loop header
LB: loop body
LE: loop exit
PB: predicated region body
PF: predicated region fallthrough
CT: control target
= control target key end

     0   :  { %s168_s14 = smov 127   ;;  %s170_s15 = smov 2   ;;  %vm17_vm0 = vcmask 2048   ;;  %vm31_vm1 = vcmask 10248   ;;  %vm45_vm2 = vcmask 18448   ;;  %s253_s0 = inlined_call_operand.vmem [shape: f32[4,3,2], index: 0, kind: input, shape index: {}]   ;;  %s254_s1 = inlined_call_operand.vmem [shape: f32[12,3], index: 1, kind: output, shape index: {}]  }
   0x1   :  { %v8_v0 = vld [vmem:[%s253_s0] sm:$0x7]  ;;  %v187_v1 = vld [vmem:[%s253_s0 + $0x8] sm:$0x7]  ;;  %v192_v2 = vld [vmem:[%s253_s0 + $0x4] sm:$0x7] }
   0x2   :  { %v20_v3 = vmul.f32 -0.1953906, %v8_v0  ;;  %v96_v4 = vmul.f32 -0.1953906, %v187_v1  ;;  %v198_v5 = vld [vmem:[%s253_s0 + $0xc] sm:$0x7] }
   0x3   :  { %v59_v6 = vmul.f32 -0.1953906, %v192_v2  ;;  %v133_v7 = vmul.f32 -0.1953906, %v198_v5  ;;  %v72_v8 = vmul.f32 -0.5384076, %v192_v2 }
   0x4   :  { %22 = vrot.lane.b32.xlu0 %v20_v3, %s168_s14  ;;  %98 = vrot.lane.b32.xlu1 %v96_v4, %s168_s14  ;;  %v34_v9 = vmul.f32 -0.5384076, %v8_v0  ;;  %v146_v10 = vmul.f32 -0.5384076, %v198_v5  ;;  %v109_v11 = vmul.f32 -0.5384076, %v187_v1 }
   0x5   :  { %v10_v12 = vmul.f32 -0.6775622, %v8_v0  ;;  %v50_v13 = vmul.f32 -0.6775622, %v192_v2  ;;  %v87_v14 = vmul.f32 -0.6775622, %v187_v1 }
   0x6   :  { %v124_v15 = vmul.f32 -0.6775622, %v198_v5  ;;  %v19_v16 = vmul.f32 0.11515446, %v8_v0  ;;  %v95_v17 = vmul.f32 0.11515446, %v187_v1 }
   0x7   :  { %v58_v22 = vmul.f32 0.11515446, %v192_v2  ;;  %v132_v23 = vmul.f32 0.11515446, %v198_v5  ;;  %v71_v27 = vmul.f32 -0.39168382, %v192_v2 }
   0x8   :  { %61 = vrot.lane.b32.xlu0 %v59_v6, %s168_s14  ;;  %135 = vrot.lane.b32.xlu1 %v133_v7, %s168_s14  ;;  %s169_s0 = smov 1   ;;  %v33_v31 = vmul.f32 -0.39168382, %v8_v0  ;;  %v145_v35 = vmul.f32 -0.39168382, %v198_v5 }
   0x9   :  { %v108_v39 = vmul.f32 -0.39168382, %v187_v1  ;;  %v9_v43 = vmul.f32 -0.69679177, %v8_v0  ;;  %v49_v47 = vmul.f32 -0.69679177, %v192_v2 }
   0xa   :  { %v86_v51 = vmul.f32 -0.69679177, %v187_v1  ;;  %v123_v55 = vmul.f32 -0.69679177, %v198_v5 }
   0xc   :  { %74 = vrot.lane.b32.xlu1 %v72_v8, %s168_s14  ;;  %36 = vrot.lane.b32.xlu0 %v34_v9, %s168_s14 }
  0x10   :  { %148 = vrot.lane.b32.xlu1 %v146_v10, %s168_s14  ;;  %111 = vrot.lane.b32.xlu0 %v109_v11, %s168_s14 }
  0x14   :  { %12 = vrot.lane.b32.xlu0 %v10_v12, %s168_s14  ;;  %52 = vrot.lane.b32.xlu1 %v50_v13, %s168_s14 }
  0x18   :  { %89 = vrot.lane.b32.xlu0 %v87_v14, %s168_s14  ;;  %126 = vrot.lane.b32.xlu1 %v124_v15, %s168_s14 }
  0x76   :  { %v23_v18 = vpop.permute.xlu0 %22  ;;  %v99_v19 = vpop.permute.xlu1 %98 }
  0x77   :  { %v25_v20 = vadd.f32 %v23_v18, %v19_v16  ;;  %v101_v21 = vadd.f32 %v99_v19, %v95_v17 }
  0x79   :  { %v26_v24 = vadd.f32 0.5830701, %v25_v20  ;;  %v102_v28 = vadd.f32 0.5830701, %v101_v21 }
  0x7a   :  { %v62_v25 = vpop.permute.xlu0 %61  ;;  %v136_v26 = vpop.permute.xlu1 %135 }
  0x7b   :  { %v64_v29 = vadd.f32 %v62_v25, %v58_v22  ;;  %28 = vrot.lane.b32.xlu0 %v26_v24, %s169_s0  ;;  %v138_v30 = vadd.f32 %v136_v26, %v132_v23 }
  0x7d   :  { %v65_v32 = vadd.f32 0.5830701, %v64_v29  ;;  %v139_v36 = vadd.f32 0.5830701, %v138_v30 }
  0x7e   :  { %v75_v33 = vpop.permute.xlu1 %74  ;;  %v37_v34 = vpop.permute.xlu0 %36 }
  0x7f   :  { %67 = vrot.lane.b32.xlu1 %v65_v32, %s169_s0  ;;  %104 = vrot.lane.b32.xlu0 %v102_v28, %s169_s0  ;;  %v77_v37 = vadd.f32 %v75_v33, %v71_v27  ;;  %v39_v38 = vadd.f32 %v37_v34, %v33_v31 }
  0x81   :  { %v40_v40 = vadd.f32 -0.22479257, %v39_v38  ;;  %v78_v44 = vadd.f32 -0.22479257, %v77_v37 }
  0x82   :  { %v149_v41 = vpop.permute.xlu1 %148  ;;  %v112_v42 = vpop.permute.xlu0 %111 }
  0x83   :  { %141 = vrot.lane.b32.xlu1 %v139_v36, %s169_s0  ;;  %v151_v45 = vadd.f32 %v149_v41, %v145_v35  ;;  %v114_v46 = vadd.f32 %v112_v42, %v108_v39  ;;  %42 = vrot.lane.b32.xlu0 %v40_v40, %s170_s15 }
  0x85   :  { %v115_v48 = vadd.f32 -0.22479257, %v114_v46  ;;  %v152_v52 = vadd.f32 -0.22479257, %v151_v45 }
  0x86   :  { %v13_v49 = vpop.permute.xlu0 %12  ;;  %v53_v50 = vpop.permute.xlu1 %52 }
  0x87   :  { %80 = vrot.lane.b32.xlu1 %v78_v44, %s170_s15  ;;  %117 = vrot.lane.b32.xlu0 %v115_v48, %s170_s15  ;;  %v15_v53 = vadd.f32 %v13_v49, %v9_v43  ;;  %v55_v54 = vadd.f32 %v53_v50, %v49_v47 }
  0x89   :  { %v16_v56 = vadd.f32 0.5691495, %v15_v53  ;;  %v56_v57 = vadd.f32 0.5691495, %v55_v54 }
  0x8a   :  { %v90_v58 = vpop.permute.xlu0 %89  ;;  %v127_v59 = vpop.permute.xlu1 %126 }
  0x8b   :  { %154 = vrot.lane.b32.xlu1 %v152_v52, %s170_s15  ;;  %18 = vst.msk [vmem:[%s254_s1] sm:$0x7] %vm17_vm0, %v16_v56  ;;  %57 = vst.msk [vmem:[%s254_s1 + $0x3] sm:$0x7] %vm17_vm0, %v56_v57  ;;  %v92_v60 = vadd.f32 %v90_v58, %v86_v51  ;;  %v129_v61 = vadd.f32 %v127_v59, %v123_v55 }
  0x8d   :  { %v93_v62 = vadd.f32 0.5691495, %v92_v60  ;;  %v130_v63 = vadd.f32 0.5691495, %v129_v61 }
  0x8f   :  { %94 = vst.msk [vmem:[%s254_s1 + $0x6] sm:$0x7] %vm17_vm0, %v93_v62  ;;  %131 = vst.msk [vmem:[%s254_s1 + $0x9] sm:$0x7] %vm17_vm0, %v130_v63 }
  0xed   :  { %v29_v0 = vpop.permute.xlu0 %28 }
  0xee   :  { %32 = vst.msk [vmem:[%s254_s1] sm:$0x7] %vm31_vm1, %v29_v0 }
  0xf1   :  { %v68_v1 = vpop.permute.xlu1 %67  ;;  %v105_v2 = vpop.permute.xlu0 %104 }
  0xf2   :  { %70 = vst.msk [vmem:[%s254_s1 + $0x3] sm:$0x7] %vm31_vm1, %v68_v1  ;;  %107 = vst.msk [vmem:[%s254_s1 + $0x6] sm:$0x7] %vm31_vm1, %v105_v2 }
  0xf5   :  { %v142_v3 = vpop.permute.xlu1 %141  ;;  %v43_v4 = vpop.permute.xlu0 %42 }
  0xf6   :  { %144 = vst.msk [vmem:[%s254_s1 + $0x9] sm:$0x7] %vm31_vm1, %v142_v3 }
  0xf7   :  { %46 = vst.msk [vmem:[%s254_s1] sm:$0x7] %vm45_vm2, %v43_v4 }
  0xf9   :  { %v81_v5 = vpop.permute.xlu1 %80  ;;  %v118_v6 = vpop.permute.xlu0 %117 }
  0xfa   :  { %83 = vst.msk [vmem:[%s254_s1 + $0x3] sm:$0x7] %vm45_vm2, %v81_v5  ;;  %120 = vst.msk [vmem:[%s254_s1 + $0x6] sm:$0x7] %vm45_vm2, %v118_v6 }
  0xfd   :  { %v155_v7 = vpop.permute.xlu1 %154 }
  0xfe   :  { %157 = vst.msk [vmem:[%s254_s1 + $0x9] sm:$0x7] %vm45_vm2, %v155_v7 }

</bundles_post_ra>
